<compile_context>
chip_gen: v6e
topology: v6e:2x2x1
jax: 0.10.0
libtpu: 0.0.40
codegen_flags: <defaults>
</compile_context>

<pallas_src>
import jax
import jax.numpy as jnp
from jax.experimental import pallas as pl
from jax.experimental.pallas import tpu as pltpu


NUM_MID_LAYERS = 3          # matches MLP(..., num_layers=3) default
_LANE = 128
_SUBLANE = 8


def _round_up(x, m):
    return (x + m - 1) // m * m


def _pad2d(a, rows, cols):
    r, c = a.shape
    if r == rows and c == cols:
        return a
    return jnp.pad(a, ((0, rows - r), (0, cols - c)))


def _layer(h, w_ref, b_ref, out_dtype):
    # y = relu(h @ W + b): MXU matmul with f32 accumulation; bias/ReLU in f32.
    acc = jnp.dot(h, w_ref[...], preferred_element_type=jnp.float32)
    return jnp.maximum(acc + b_ref[...], 0.0).astype(out_dtype)


def mlp_kernel(x_ref,
               w_in_ref, b_in_ref,
               w_m0_ref, b_m0_ref,
               w_m1_ref, b_m1_ref,
               w_m2_ref, b_m2_ref,
               w_out_ref, b_out_ref,
               o_ref):
    cdt = w_in_ref.dtype                        # compute dtype (bf16 or f32)
    h = _layer(x_ref[...], w_in_ref, b_in_ref, cdt)
    h = _layer(h, w_m0_ref, b_m0_ref, cdt)
    h = _layer(h, w_m1_ref, b_m1_ref, cdt)
    h = _layer(h, w_m2_ref, b_m2_ref, cdt)
    o_ref[...] = _layer(h, w_out_ref, b_out_ref, o_ref.dtype)   # ReLU after out_layer too


def mlp_pallas(x, params, *, batch_tile=None, compute_dtype=jnp.bfloat16):
    """params: dict with 'w_in','b_in','w_mid' (list), 'b_mid' (list), 'w_out','b_out'.
    Weights are PyTorch-style [out_features, in_features]; biases [1, out_features]."""
    B, in_dim = x.shape
    mid_dim = params["w_in"].shape[0]
    out_dim = params["w_out"].shape[0]

    # ---- padded (lane-dense) feature dims & batch tiling --------------------
    in_p = _round_up(in_dim, _LANE)
    mid_p = _round_up(mid_dim, _LANE)
    out_p = _round_up(out_dim, _LANE)

    if batch_tile is None:
        # Aim for >= 2 grid steps (pipelining + 2-TC sharding on v7x), cap the
        # tile so x/h/out working sets stay modest.
        tb = min(256, _round_up(pl.cdiv(B, 2), _SUBLANE))
    else:
        tb = _round_up(batch_tile, _SUBLANE)
    B_p = _round_up(B, tb)
    grid = (B_p // tb,)

    # ---- operand prep: pad, pre-transpose weights once, cast ----------------
    cdt = jnp.dtype(compute_dtype)
    x_p = _pad2d(x, B_p, in_p).astype(cdt)

    def prep(w, b, rows_p, cols_p):
        # [out, in] -> [in, out] on the host (free layout plumbing); zero-pad so
        # padded input/output feature columns stay exactly zero through ReLU.
        w_t = _pad2d(jnp.asarray(w).T, rows_p, cols_p).astype(cdt)
        b_p = _pad2d(jnp.asarray(b), 1, cols_p).astype(jnp.float32)
        return w_t, b_p

    layer_ops = [prep(params["w_in"], params["b_in"], in_p, mid_p)]
    for l in range(NUM_MID_LAYERS):
        layer_ops.append(prep(params["w_mid"][l], params["b_mid"][l], mid_p, mid_p))
    layer_ops.append(prep(params["w_out"], params["b_out"], mid_p, out_p))

    operands = [x_p]
    in_specs = [pl.BlockSpec((tb, in_p), lambda i: (i, 0))]
    for w_t, b_p in layer_ops:
        # Whole (padded) weight & bias resident; same block every grid step, so
        # Pallas skips re-DMA between consecutive steps. (pipeline_mode=
        # pl.Buffered(1) could further halve their VMEM buffers if supported.)
        in_specs.append(pl.BlockSpec(w_t.shape, lambda i: (0, 0)))
        in_specs.append(pl.BlockSpec(b_p.shape, lambda i: (0, 0)))
        operands.append(w_t)
        operands.append(b_p)

    out_spec = pl.BlockSpec((tb, out_p), lambda i: (i, 0))

    # ---- cost estimate & VMEM budget (re-derived per call) ------------------
    weight_elems = in_p * mid_p + NUM_MID_LAYERS * mid_p * mid_p + mid_p * out_p
    bias_elems = (NUM_MID_LAYERS + 1) * mid_p + out_p
    flops = 2 * B_p * (in_p * mid_p + NUM_MID_LAYERS * mid_p * mid_p + mid_p * out_p)
    bytes_accessed = int(B_p * in_p * cdt.itemsize
                         + weight_elems * cdt.itemsize
                         + bias_elems * 4
                         + B_p * out_p * jnp.dtype(x.dtype).itemsize)
    cost = pl.CostEstimate(flops=flops, transcendentals=0,
                           bytes_accessed=bytes_accessed)

    # Double-buffered x/out tiles + (2x-buffered) resident weights + f32 activations.
    vmem_est = (2 * tb * (in_p + out_p) * 4
                + 2 * (weight_elems * cdt.itemsize + bias_elems * 4)
                + tb * mid_p * 4)
    # Keep under v7x's 64 MiB/TC with headroom; v5e/v6e have 128 MiB physical.
    vmem_limit = int(min(max(2 * vmem_est, 32 * 1024 * 1024), 48 * 1024 * 1024))

    # TODO(synk): for very large mid_dim (weights not VMEM-resident even in bf16)
    # add an output-feature (N) tile per layer instead of one fully fused call.

    out_padded = pl.pallas_call(
        mlp_kernel,
        out_shape=jax.ShapeDtypeStruct((B_p, out_p), x.dtype),
        grid_spec=pltpu.PrefetchScalarGridSpec(
            num_scalar_prefetch=0,
            grid=grid,
            in_specs=in_specs,
            out_specs=out_spec,
        ),
        compiler_params=pltpu.CompilerParams(
            dimension_semantics=("parallel",),
            vmem_limit_bytes=vmem_limit),
        cost_estimate=cost,
    )(*operands)

    return out_padded[:B, :out_dim]


def mlp_reference(x, params):
    h = jnp.maximum(x @ params["w_in"].T + params["b_in"], 0.0)
    for l in range(NUM_MID_LAYERS):
        h = jnp.maximum(h @ params["w_mid"][l].T + params["b_mid"][l], 0.0)
    return jnp.maximum(h @ params["w_out"].T + params["b_out"], 0.0)


def init_params(key, in_dim, mid_dim, out_dim):
    """Deterministic init mimicking nn.Linear's U(-1/sqrt(fan_in), 1/sqrt(fan_in))."""
    def linear(k, fan_out, fan_in):
        kw, kb = jax.random.split(k)
        bound = 1.0 / jnp.sqrt(fan_in)
        w = jax.random.uniform(kw, (fan_out, fan_in), jnp.float32, -bound, bound)
        b = jax.random.uniform(kb, (1, fan_out), jnp.float32, -bound, bound)
        return w, b

    keys = jax.random.split(key, 2 + NUM_MID_LAYERS)
    w_in, b_in = linear(keys[0], mid_dim, in_dim)
    w_mid, b_mid = [], []
    for l in range(NUM_MID_LAYERS):
        w, b = linear(keys[1 + l], mid_dim, mid_dim)
        w_mid.append(w)
        b_mid.append(b)
    w_out, b_out = linear(keys[-1], out_dim, mid_dim)
    return {"w_in": w_in, "b_in": b_in,
            "w_mid": w_mid, "b_mid": b_mid,
            "w_out": w_out, "b_out": b_out}


if __name__ == "__main__":
    key = jax.random.PRNGKey(0)
    kx, kp = jax.random.split(key)

    B, in_dim, mid_dim, out_dim = 16, 16, 32, 8
    x = jax.random.normal(kx, (B, in_dim), jnp.float32)
    params = init_params(kp, in_dim, mid_dim, out_dim)

    ref = mlp_reference(x, params)

    # Correctness check: f32 compute path, tight tolerance.
    out_f32 = jax.block_until_ready(mlp_pallas(x, params, compute_dtype=jnp.float32))
    assert out_f32.shape == (B, out_dim)
    assert jnp.allclose(out_f32, ref, atol=1e-5, rtol=1e-5), "f32 mismatch vs reference"

    # Performance path: bf16 weights/activations with f32 accumulation.
    out_bf16 = jax.block_until_ready(mlp_pallas(x, params, compute_dtype=jnp.bfloat16))
    assert out_bf16.shape == (B, out_dim)
    assert jnp.allclose(out_bf16, ref, atol=5e-2, rtol=5e-2), "bf16 mismatch vs reference"

    print("KERNEL_OK")
</pallas_src>

<mosaic_0001>
module attributes {stable_mosaic.version = 11 : i64} {
  func.func @mlp_kernel(%arg0: i32, %arg1: memref<8x128xf32, #tpu.memory_space<vmem>>, %arg2: memref<128x128xf32, #tpu.memory_space<vmem>>, %arg3: memref<1x128xf32, #tpu.memory_space<vmem>>, %arg4: memref<128x128xf32, #tpu.memory_space<vmem>>, %arg5: memref<1x128xf32, #tpu.memory_space<vmem>>, %arg6: memref<128x128xf32, #tpu.memory_space<vmem>>, %arg7: memref<1x128xf32, #tpu.memory_space<vmem>>, %arg8: memref<128x128xf32, #tpu.memory_space<vmem>>, %arg9: memref<1x128xf32, #tpu.memory_space<vmem>>, %arg10: memref<128x128xf32, #tpu.memory_space<vmem>>, %arg11: memref<1x128xf32, #tpu.memory_space<vmem>>, %arg12: memref<8x128xf32, #tpu.memory_space<vmem>>) attributes {dimension_semantics = [#tpu.dimension_semantics<parallel>], iteration_bounds = array<i64: 2>, scalar_prefetch = 0 : i64, scratch_operands = 0 : i64, tpu.core_type = #tpu.core_type<tc>, window_params = [{transform_indices = @transform_0, window_bounds = array<i64: 8, 128>}, {pipeline_mode = #tpu.pipeline_mode<synchronous>, transform_indices = @transform_1, window_bounds = array<i64: 128, 128>}, {pipeline_mode = #tpu.pipeline_mode<synchronous>, transform_indices = @transform_2, window_bounds = array<i64: 1, 128>}, {pipeline_mode = #tpu.pipeline_mode<synchronous>, transform_indices = @transform_3, window_bounds = array<i64: 128, 128>}, {pipeline_mode = #tpu.pipeline_mode<synchronous>, transform_indices = @transform_4, window_bounds = array<i64: 1, 128>}, {pipeline_mode = #tpu.pipeline_mode<synchronous>, transform_indices = @transform_5, window_bounds = array<i64: 128, 128>}, {pipeline_mode = #tpu.pipeline_mode<synchronous>, transform_indices = @transform_6, window_bounds = array<i64: 1, 128>}, {pipeline_mode = #tpu.pipeline_mode<synchronous>, transform_indices = @transform_7, window_bounds = array<i64: 128, 128>}, {pipeline_mode = #tpu.pipeline_mode<synchronous>, transform_indices = @transform_8, window_bounds = array<i64: 1, 128>}, {pipeline_mode = #tpu.pipeline_mode<synchronous>, transform_indices = @transform_9, window_bounds = array<i64: 128, 128>}, {pipeline_mode = #tpu.pipeline_mode<synchronous>, transform_indices = @transform_10, window_bounds = array<i64: 1, 128>}, {transform_indices = @transform_11, window_bounds = array<i64: 8, 128>}]} {
    %c0 = arith.constant 0 : index
    %c0_0 = arith.constant 0 : index
    %0 = vector.load %arg1[%c0, %c0_0] : memref<8x128xf32, #tpu.memory_space<vmem>>, vector<8x128xf32>
    %c0_1 = arith.constant 0 : index
    %c0_2 = arith.constant 0 : index
    %1 = vector.load %arg2[%c0_1, %c0_2] : memref<128x128xf32, #tpu.memory_space<vmem>>, vector<128x128xf32>
    %cst = arith.constant dense<0.000000e+00> : vector<8x128xf32>
    %2 = tpu.matmul %0, %1, %cst {dimension_numbers = #tpu.dot_dimension_numbers<[1], [0], [0], [1], [0, 0, 1, 1], [], []>} : vector<8x128xf32>, vector<128x128xf32>, vector<8x128xf32> -> vector<8x128xf32>
    %c0_3 = arith.constant 0 : index
    %c0_4 = arith.constant 0 : index
    %3 = vector.load %arg3[%c0_3, %c0_4] : memref<1x128xf32, #tpu.memory_space<vmem>>, vector<1x128xf32>
    %4 = vector.broadcast %3 : vector<1x128xf32> to vector<8x128xf32>
    %5 = arith.addf %2, %4 : vector<8x128xf32>
    %cst_5 = arith.constant 0.000000e+00 : f32
    %6 = vector.broadcast %cst_5 : f32 to vector<8x128xf32>
    %7 = arith.maximumf %5, %6 : vector<8x128xf32>
    %c0_6 = arith.constant 0 : index
    %c0_7 = arith.constant 0 : index
    %8 = vector.load %arg4[%c0_6, %c0_7] : memref<128x128xf32, #tpu.memory_space<vmem>>, vector<128x128xf32>
    %cst_8 = arith.constant dense<0.000000e+00> : vector<8x128xf32>
    %9 = tpu.matmul %7, %8, %cst_8 {dimension_numbers = #tpu.dot_dimension_numbers<[1], [0], [0], [1], [0, 0, 1, 1], [], []>} : vector<8x128xf32>, vector<128x128xf32>, vector<8x128xf32> -> vector<8x128xf32>
    %c0_9 = arith.constant 0 : index
    %c0_10 = arith.constant 0 : index
    %10 = vector.load %arg5[%c0_9, %c0_10] : memref<1x128xf32, #tpu.memory_space<vmem>>, vector<1x128xf32>
    %11 = vector.broadcast %10 : vector<1x128xf32> to vector<8x128xf32>
    %12 = arith.addf %9, %11 : vector<8x128xf32>
    %cst_11 = arith.constant 0.000000e+00 : f32
    %13 = vector.broadcast %cst_11 : f32 to vector<8x128xf32>
    %14 = arith.maximumf %12, %13 : vector<8x128xf32>
    %c0_12 = arith.constant 0 : index
    %c0_13 = arith.constant 0 : index
    %15 = vector.load %arg6[%c0_12, %c0_13] : memref<128x128xf32, #tpu.memory_space<vmem>>, vector<128x128xf32>
    %cst_14 = arith.constant dense<0.000000e+00> : vector<8x128xf32>
    %16 = tpu.matmul %14, %15, %cst_14 {dimension_numbers = #tpu.dot_dimension_numbers<[1], [0], [0], [1], [0, 0, 1, 1], [], []>} : vector<8x128xf32>, vector<128x128xf32>, vector<8x128xf32> -> vector<8x128xf32>
    %c0_15 = arith.constant 0 : index
    %c0_16 = arith.constant 0 : index
    %17 = vector.load %arg7[%c0_15, %c0_16] : memref<1x128xf32, #tpu.memory_space<vmem>>, vector<1x128xf32>
    %18 = vector.broadcast %17 : vector<1x128xf32> to vector<8x128xf32>
    %19 = arith.addf %16, %18 : vector<8x128xf32>
    %cst_17 = arith.constant 0.000000e+00 : f32
    %20 = vector.broadcast %cst_17 : f32 to vector<8x128xf32>
    %21 = arith.maximumf %19, %20 : vector<8x128xf32>
    %c0_18 = arith.constant 0 : index
    %c0_19 = arith.constant 0 : index
    %22 = vector.load %arg8[%c0_18, %c0_19] : memref<128x128xf32, #tpu.memory_space<vmem>>, vector<128x128xf32>
    %cst_20 = arith.constant dense<0.000000e+00> : vector<8x128xf32>
    %23 = tpu.matmul %21, %22, %cst_20 {dimension_numbers = #tpu.dot_dimension_numbers<[1], [0], [0], [1], [0, 0, 1, 1], [], []>} : vector<8x128xf32>, vector<128x128xf32>, vector<8x128xf32> -> vector<8x128xf32>
    %c0_21 = arith.constant 0 : index
    %c0_22 = arith.constant 0 : index
    %24 = vector.load %arg9[%c0_21, %c0_22] : memref<1x128xf32, #tpu.memory_space<vmem>>, vector<1x128xf32>
    %25 = vector.broadcast %24 : vector<1x128xf32> to vector<8x128xf32>
    %26 = arith.addf %23, %25 : vector<8x128xf32>
    %cst_23 = arith.constant 0.000000e+00 : f32
    %27 = vector.broadcast %cst_23 : f32 to vector<8x128xf32>
    %28 = arith.maximumf %26, %27 : vector<8x128xf32>
    %c0_24 = arith.constant 0 : index
    %c0_25 = arith.constant 0 : index
    %29 = vector.load %arg10[%c0_24, %c0_25] : memref<128x128xf32, #tpu.memory_space<vmem>>, vector<128x128xf32>
    %cst_26 = arith.constant dense<0.000000e+00> : vector<8x128xf32>
    %30 = tpu.matmul %28, %29, %cst_26 {dimension_numbers = #tpu.dot_dimension_numbers<[1], [0], [0], [1], [0, 0, 1, 1], [], []>} : vector<8x128xf32>, vector<128x128xf32>, vector<8x128xf32> -> vector<8x128xf32>
    %c0_27 = arith.constant 0 : index
    %c0_28 = arith.constant 0 : index
    %31 = vector.load %arg11[%c0_27, %c0_28] : memref<1x128xf32, #tpu.memory_space<vmem>>, vector<1x128xf32>
    %32 = vector.broadcast %31 : vector<1x128xf32> to vector<8x128xf32>
    %33 = arith.addf %30, %32 : vector<8x128xf32>
    %cst_29 = arith.constant 0.000000e+00 : f32
    %34 = vector.broadcast %cst_29 : f32 to vector<8x128xf32>
    %35 = arith.maximumf %33, %34 : vector<8x128xf32>
    %c0_30 = arith.constant 0 : index
    %c0_31 = arith.constant 0 : index
    %36 = vector.load %arg12[%c0_30, %c0_31] : memref<8x128xf32, #tpu.memory_space<vmem>>, vector<8x128xf32>
    tpu.vector_store %arg12[%c0_30, %c0_31], %35 {strides = array<i32>} : memref<8x128xf32, #tpu.memory_space<vmem>>, vector<8x128xf32>,
    return
  }
  func.func @transform_0(%arg0: i32) -> (i32, i32) {
    %c0_i32 = arith.constant 0 : i32
    %c0_i32_0 = arith.constant 0 : i32
    return %arg0, %c0_i32 : i32, i32
  }
  func.func @transform_1(%arg0: i32) -> (i32, i32) {
    %c0_i32 = arith.constant 0 : i32
    %c0_i32_0 = arith.constant 0 : i32
    %c0_i32_1 = arith.constant 0 : i32
    return %c0_i32, %c0_i32_0 : i32, i32
  }
  func.func @transform_2(%arg0: i32) -> (i32, i32) {
    %c0_i32 = arith.constant 0 : i32
    %c0_i32_0 = arith.constant 0 : i32
    %c0_i32_1 = arith.constant 0 : i32
    return %c0_i32, %c0_i32_0 : i32, i32
  }
  func.func @transform_3(%arg0: i32) -> (i32, i32) {
    %c0_i32 = arith.constant 0 : i32
    %c0_i32_0 = arith.constant 0 : i32
    %c0_i32_1 = arith.constant 0 : i32
    return %c0_i32, %c0_i32_0 : i32, i32
  }
  func.func @transform_4(%arg0: i32) -> (i32, i32) {
    %c0_i32 = arith.constant 0 : i32
    %c0_i32_0 = arith.constant 0 : i32
    %c0_i32_1 = arith.constant 0 : i32
    return %c0_i32, %c0_i32_0 : i32, i32
  }
  func.func @transform_5(%arg0: i32) -> (i32, i32) {
    %c0_i32 = arith.constant 0 : i32
    %c0_i32_0 = arith.constant 0 : i32
    %c0_i32_1 = arith.constant 0 : i32
    return %c0_i32, %c0_i32_0 : i32, i32
  }
  func.func @transform_6(%arg0: i32) -> (i32, i32) {
    %c0_i32 = arith.constant 0 : i32
    %c0_i32_0 = arith.constant 0 : i32
    %c0_i32_1 = arith.constant 0 : i32
    return %c0_i32, %c0_i32_0 : i32, i32
  }
  func.func @transform_7(%arg0: i32) -> (i32, i32) {
    %c0_i32 = arith.constant 0 : i32
    %c0_i32_0 = arith.constant 0 : i32
    %c0_i32_1 = arith.constant 0 : i32
    return %c0_i32, %c0_i32_0 : i32, i32
  }
  func.func @transform_8(%arg0: i32) -> (i32, i32) {
    %c0_i32 = arith.constant 0 : i32
    %c0_i32_0 = arith.constant 0 : i32
    %c0_i32_1 = arith.constant 0 : i32
    return %c0_i32, %c0_i32_0 : i32, i32
  }
  func.func @transform_9(%arg0: i32) -> (i32, i32) {
    %c0_i32 = arith.constant 0 : i32
    %c0_i32_0 = arith.constant 0 : i32
    %c0_i32_1 = arith.constant 0 : i32
    return %c0_i32, %c0_i32_0 : i32, i32
  }
  func.func @transform_10(%arg0: i32) -> (i32, i32) {
    %c0_i32 = arith.constant 0 : i32
    %c0_i32_0 = arith.constant 0 : i32
    %c0_i32_1 = arith.constant 0 : i32
    return %c0_i32, %c0_i32_0 : i32, i32
  }
  func.func @transform_11(%arg0: i32) -> (i32, i32) {
    %c0_i32 = arith.constant 0 : i32
    %c0_i32_0 = arith.constant 0 : i32
    return %arg0, %c0_i32 : i32, i32
  }
}

</mosaic_0001>

<bundles_post_ra>
// kernel: tpu_custom_call.1
= control target key start
LH: loop header
LB: loop body
LE: loop exit
PB: predicated region body
PF: predicated region fallthrough
CT: control target
= control target key end

     0   :  { %s2109_s0 = inlined_call_operand.hbm [shape: f32[16,128], index: 0, kind: input, shape index: {}]   ;;  %s2110_s1 = inlined_call_operand.hbm [shape: f32[128,128], index: 1, kind: input, shape index: {}]   ;;  %s2111_s2 = inlined_call_operand.vmem [shape: f32[1,128], index: 2, kind: input, shape index: {}]   ;;  %s2112_s3 = inlined_call_operand.hbm [shape: f32[128,128], index: 3, kind: input, shape index: {}]   ;;  %s2113_s4 = inlined_call_operand.vmem [shape: f32[1,128], index: 4, kind: input, shape index: {}]   ;;  %s2114_s5 = inlined_call_operand.hbm [shape: f32[128,128], index: 5, kind: input, shape index: {}]   ;;  %s2115_s6 = inlined_call_operand.vmem [shape: f32[1,128], index: 6, kind: input, shape index: {}]   ;;  %s2116_s7 = inlined_call_operand.hbm [shape: f32[128,128], index: 7, kind: input, shape index: {}]   ;;  %s2117_s8 = inlined_call_operand.vmem [shape: f32[1,128], index: 8, kind: input, shape index: {}]   ;;  %s2118_s9 = inlined_call_operand.hbm [shape: f32[128,128], index: 9, kind: input, shape index: {}]   ;;  %s2119_s10 = inlined_call_operand.vmem [shape: f32[1,128], index: 10, kind: input, shape index: {}]   ;;  %s2120_s11 = inlined_call_operand.hbm [shape: f32[16,128], index: 11, kind: output, shape index: {}]  }
   0x1   :  { %2125 = sst [smem:[#allocation20_spill]] %s2110_s1 }
   0x2   :  { %2126 = sst [smem:[#allocation21_spill]] %s2112_s3 }
   0x3   :  { %2127 = sst [smem:[#allocation22_spill]] %s2114_s5 }
   0x4   :  { %2128 = sst [smem:[#allocation23_spill]] %s2116_s7 }
   0x5   :  { %2129 = sst [smem:[#allocation24_spill]] %s2118_s9 }
   0x6   :  { %16 = vsyncpa [#allocation3], 0 }
   0x7   :  { %18 = vsyncpa [#allocation3 + $0x1], 0 }
   0x8   :  { %19 = vsyncpa [#allocation6], 0 }
   0x9   :  { %20 = vsyncpa [#allocation9], 0 }
   0xa   :  { %21 = vsyncpa [#allocation12], 0 }
   0xb   :  { %22 = vsyncpa [#allocation4], 0 }
   0xc   :  { %24 = vsyncpa [#allocation4 + $0x1], 0  ;;  %s1774_s17 = smov 0   ;;  %s1776_s18 = smov 0  }
   0xd   :  { %s1778_s19 = smov 0   ;;  %s1780_s20 = smov 0  }
   0xe LB: > { %s1703_s21 = smov [#allocation5]   ;;  %s1795_s23 = sadd.s32 4294967295, %s1701_s20   ;;  %s1701_s20 = sphi %s1780_s20, %s2158_s20   ;;  %s1697_s19 = sphi %s1778_s19, %s2157_s19   ;;  %s1693_s18 = sphi %s1776_s18, %s2156_s18   ;;  %s1689_s17 = sphi %s1774_s17, %s2155_s17  }
   0xf   : > { %s309_s22 = sshll.u32 %s1703_s21, 4  ;;  %p1080_p0 = scmp.ge.s32.totalorder %s1701_s20, 1  ;;  %s310_s22 = int_to_ptr.vmem [resolvable:$true] %s309_s22 }
  0x10   : > { %p2121_p1 = scmp.eq.s32.totalorder %s1795_s23, 0  ;;  %p297_p2 = scmp.lt.s32.totalorder %s1701_s20, 3 }
  0x11   : > { %s1704_s25 = smov [#allocation8]   ;;  %s1705_s28 = smov [#allocation7]  }
  0x12   : > { %p1800_p3 = pnand %p1080_p0, %p297_p2  ;;  %s341_s26 = sshll.u32 %s1704_s25, 4  ;;  %s1813_s26 = int_to_ptr.vmem [resolvable:$true] %s341_s26 }
  0x13   : > { %s325_s29 = sshll.u32 %s1705_s28, 4  ;;  %s1478_s12 = scalar_lea.vmem %s310_s22, 2048  ;;  %s1815_s29 = int_to_ptr.vmem [resolvable:$true] %s325_s29 }
  0x14   : > { %s2130_s24 = scalar_select %p1800_p3, 1, 0 }
  0x15   : > { %p1390_p5 = pneg %p1800_p3  ;;  %p1479_p8 = scmp.ne.s32.totalorder %s310_s22, %s1478_s12 }
  0x16   : > { %p1486_p11 = scmp.lt.s32.totalorder %s310_s22, %s310_s22  ;;  %p1487_p12 = scmp.lt.s32.totalorder %s1478_s12, %s1478_s12 }
  0x17   : > { %p1809_p6 = pnand %p1390_p5, %p2121_p1 }
  0x18   : > { %p1488_p13 = por %p1487_p12, %p1486_p11 }
  0x19   : > { %p1819_p7 = pneg %p1809_p6 }
  0x1b   : > { %p1481_p9 = pnand %p1479_p8, %p1819_p7 }
  0x1d   : > { %p1482_p10 = pneg %p1481_p9 }
  0x1f   : > { %p1489_p0 = pnand %p1488_p13, %p1482_p10 }
  0x21   : > { %1492 = shalt.err (!%p1489_p0)
}
  0x22   : > { %s1706_s13 = smov 128   ;;  %s1707_s14 = smov 8  }
  0x23   : > { %s2133_s1 = sld [smem:[#allocation20_spill]]  ;;  %s1504_s21 = scalar_lea.vmem %s1813_s26, 2048 }
  0x24   : > { %p1505_p2 = scmp.ne.s32.totalorder %s1813_s26, %s1504_s21  ;;  %p1512_p9 = scmp.lt.s32.totalorder %s1813_s26, %s1813_s26 }
  0x25   : > { %p1513_p10 = scmp.lt.s32.totalorder %s1504_s21, %s1504_s21 }
  0x26   : > { %p1507_p5 = pnand %p1505_p2, %p1819_p7 }
  0x27   : > { %p1514_p11 = por %p1513_p10, %p1512_p9 }
  0x28   : > { %p1508_p8 = pneg %p1507_p5 }
  0x29   : > { %1393 = dma.hbm_to_vmem [thread:$0]  (!%p1809_p6), %s2133_s1, 2048, %s310_s22, [#allocation6], %s1706_s13, %s1706_s13, %s1707_s14  }
  0x2a   : > { %p1515_p12 = pnand %p1514_p11, %p1508_p8 }
  0x2c   : > { %1518 = shalt.err (!%p1515_p12)
}
  0x2d   : > { %s2134_s5 = sld [smem:[#allocation22_spill]]  ;;  %s1530_s22 = scalar_lea.vmem %s1815_s29, 2048 }
  0x2e   : > { %p1531_p13 = scmp.ne.s32.totalorder %s1815_s29, %s1530_s22  ;;  %p1538_p5 = scmp.lt.s32.totalorder %s1815_s29, %s1815_s29 }
  0x2f   : > { %p1539_p8 = scmp.lt.s32.totalorder %s1530_s22, %s1530_s22 }
  0x30   : > { %p1533_p0 = pnand %p1531_p13, %p1819_p7 }
  0x31   : > { %p1540_p9 = por %p1539_p8, %p1538_p5 }
  0x32   : > { %p1534_p2 = pneg %p1533_p0 }
  0x33   : > { %1399 = dma.hbm_to_vmem [thread:$0]  (!%p1809_p6), %s2134_s5, 2048, %s1813_s26, [#allocation9], %s1706_s13, %s1706_s13, %s1707_s14  }
  0x34   : > { %p1541_p10 = pnand %p1540_p9, %p1534_p2 }
  0x36   : > { %1544 = shalt.err (!%p1541_p10)
}
  0x37   : > { %s2135_s3 = sld [smem:[#allocation21_spill]]  ;;  %s1708_s26 = smov [#allocation10]  }
  0x38   : > { %s357_s16 = sshll.u32 %s1708_s26, 4  ;;  %s1709_s21 = smov [#allocation11]   ;;  %s358_s16 = int_to_ptr.vmem [resolvable:$true] %s357_s16 }
  0x39   : > { %s373_s25 = sshll.u32 %s1709_s21, 4  ;;  %s1556_s28 = scalar_lea.vmem %s358_s16, 2048  ;;  %s374_s25 = int_to_ptr.vmem [resolvable:$true] %s373_s25 }
  0x3a   : > { %p1557_p11 = scmp.ne.s32.totalorder %s358_s16, %s1556_s28  ;;  %p1564_p0 = scmp.lt.s32.totalorder %s358_s16, %s358_s16 }
  0x3b   : > { %p1565_p2 = scmp.lt.s32.totalorder %s1556_s28, %s1556_s28 }
  0x3c   : > { %p1559_p12 = pnand %p1557_p11, %p1819_p7 }
  0x3d   : > { %1396 = dma.hbm_to_vmem [thread:$0]  (!%p1809_p6), %s2135_s3, 2048, %s1815_s29, [#allocation6], %s1706_s13, %s1706_s13, %s1707_s14  }
  0x3e   : > { %p1560_p13 = pneg %p1559_p12  ;;  %p1566_p5 = por %p1565_p2, %p1564_p0 }
  0x40   : > { %p1567_p8 = pnand %p1566_p5, %p1560_p13 }
  0x42   : > { %1570 = shalt.err (!%p1567_p8)
}
  0x43   : > { %s2136_s7 = sld [smem:[#allocation23_spill]]  ;;  %s1582_s12 = scalar_lea.vmem %s374_s25, 2048 }
  0x44   : > { %p1583_p9 = scmp.ne.s32.totalorder %s374_s25, %s1582_s12  ;;  %p1590_p12 = scmp.lt.s32.totalorder %s374_s25, %s374_s25 }
  0x45   : > { %p1591_p0 = scmp.lt.s32.totalorder %s1582_s12, %s1582_s12 }
  0x46   : > { %p1585_p10 = pnand %p1583_p9, %p1819_p7 }
  0x47   : > { %p1592_p13 = por %p1591_p0, %p1590_p12 }
  0x48   : > { %p1586_p11 = pneg %p1585_p10 }
  0x49   : > { %1402 = dma.hbm_to_vmem [thread:$0]  (!%p1809_p6), %s2136_s7, 2048, %s358_s16, [#allocation9], %s1706_s13, %s1706_s13, %s1707_s14  }
  0x4a   : > { %p1593_p2 = pnand %p1592_p13, %p1586_p11 }
  0x4c   : > { %1596 = shalt.err (!%p1593_p2)
}
  0x4d   : > { %s2137_s9 = sld [smem:[#allocation24_spill]]  ;;  %s1079_s27 = sadd.s32 4294967294, %s1701_s20  }
  0x4e   : > { %s1885_s30 = sadd.s32 1, %s1701_s20   ;;  %s37_s16 = sadd.s32 1, %s1697_s19 }
  0x4f   : > { %s34_s21 = ssub.s32 %s1701_s20, %s1885_s30  ;;  %p44_p7 = scmp.ne.s32.totalorder %s1697_s19, %s1693_s18 }
  0x50   : > { %p35_p5 = scmp.eq.s32.totalorder %s34_s21, 0  ;;  %p45_p8 = scmp.eq.s32.totalorder %s1701_s20, 0 }
  0x51   : > { %p50_p9 = scmp.ne.s32.totalorder %s1693_s18, %s1689_s17  ;;  %p284_p10 = scmp.eq.s32.totalorder %s1795_s23, 1 }
  0x52   : > { %s1897_s28 = scalar_select %p35_p5, %s1697_s19, %s37_s16  }
  0x53   : > { %1405 = dma.hbm_to_vmem [thread:$0]  (!%p1809_p6), %s2137_s9, 2048, %s374_s25, [#allocation12], %s1706_s13, %s1706_s13, %s1707_s14  }
  0x54   : > { %2138 = sst [smem:[#allocation19_spill]] %s1897_s28  ;;  %p46_p11 = por %p45_p8, %p44_p7 }
  0x55   : > { %p1901_p12 = por %p2121_p1, %p50_p9  ;;  %p1905_p6 = por %p284_p10, %p44_p7 }
  0x56   : > { %p290_p0 = scmp.eq.s32.totalorder %s1079_s27, 1  ;;  %p1419_p13 = scmp.lt.s32.totalorder %s1701_s20, 2 }
  0x57   : > { %s2139_s29 = scalar_select %p1901_p12, 1, 0 }
  0x58   : > { %s2140_s13 = scalar_select %p1905_p6, 1, 0 }
  0x59   : > { %s390_s14 = sand.u32 1, %s1697_s19   ;;  %p1911_p2 = por %p290_p0, %p50_p9 }
  0x5a   : > { %s1087_s22 = sshll.u32 %s390_s14, 3  ;;  %s1088_s12 = sshll.u32 %s1701_s20, 7 }
  0x5b   : > { %s2141_s25 = scalar_select %p1911_p2, 1, 0 }
  0x5c   : > { %s1919_s16 = scalar_lea.hbm %s2109_s0, %s1088_s12  ;;  %s394_s21 = scalar_lea.vmem [#allocation2], %s1087_s22 }
  0x5d   : > { %s401_s1 = sshll.u32 %s394_s21, 4  ;;  %p1921_p7 = pnand %p1419_p13, %p46_p11  ;;  %s402_s1 = int_to_ptr.vmem [resolvable:$true] %s401_s1 }
  0x5e   : > { %s391_s3 = scalar_lea.sflag [#allocation3], %s390_s14  ;;  %s1597_s5 = scalar_lea.hbm %s1919_s16, 128 }
  0x5f   : > { %p1598_p5 = scmp.ne.s32.totalorder %s1919_s16, %s1597_s5  ;;  %p1599_p8 = pneg %p1921_p7 }
  0x60   : > { %s1602_s26 = scalar_lea.hbm %s2109_s0, 256  ;;  %p1603_p11 = scmp.lt.s32.totalorder %s1919_s16, %s2109_s0 }
  0x61   : > { %p1600_p9 = pnand %p1599_p8, %p1598_p5  ;;  %p1604_p0 = scmp.lt.s32.totalorder %s1602_s26, %s1597_s5 }
  0x63   : > { %p1601_p10 = pneg %p1600_p9  ;;  %p1605_p13 = por %p1604_p0, %p1603_p11 }
  0x65   : > { %p1606_p4 = pnand %p1605_p13, %p1601_p10 }
  0x67   : > { %1609 = shalt.err (!%p1606_p4)
}
  0x68   : > { %s1610_s21 = scalar_lea.vmem %s402_s1, 128  ;;  %s1710_s14 = smov [#allocation2]  }
  0x69   : > { %p1611_p1 = scmp.ne.s32.totalorder %s402_s1, %s1610_s21  ;;  %s1615_s9 = sshll.u32 %s1710_s14, 4  ;;  %s1616_s9 = int_to_ptr.vmem [resolvable:$false] %s1615_s9 }
  0x6a   : > { %s1617_s28 = scalar_lea.vmem %s1616_s9, 256  ;;  %p1618_p5 = scmp.lt.s32.totalorder %s402_s1, %s1616_s9 }
  0x6b   : > { %p1613_p2 = pnand %p1611_p1, %p1599_p8  ;;  %p1619_p9 = scmp.lt.s32.totalorder %s1617_s28, %s1610_s21 }
  0x6d   : > { %p1614_p6 = pneg %p1613_p2  ;;  %p1620_p12 = por %p1619_p9, %p1618_p5 }
  0x6f   : > { %p1621_p3 = pnand %p1620_p12, %p1614_p6 }
  0x71   : > { %1624 = shalt.err (!%p1621_p3)
}
  0x72   : > { %1409 = dma.hbm_to_vmem [thread:$0]  (!%p1921_p7), %s1919_s16, 128, %s402_s1, %s391_s3  }
  0x73   : > { %p2143_p10 = scmp.ne.s32.totalorder %s2130_s24, 0 }
  0x74   : > { %s1942_s5 = sand.u32 (!%p2143_p10), 1, %s1693_s18   ;;  %p2144_p1 = scmp.ne.s32.totalorder (!%p2143_p10), %s2139_s29, 0 }
  0x75   : > { %410 = sbr.rel (%p2143_p10) target bundleno = 1164 (0x48c), region = 64  ;;  %s1090_s7 = sshll.u32 (!%p2143_p10), %s1942_s5, 3 }
  0x76   : > { %s413_s9 = scalar_lea.sflag (!%p2143_p10), [#allocation3], %s1942_s5  ;;  %s1948_s28 = scalar_lea.vmem (!%p2143_p10), [#allocation2], %s1090_s7 }
  0x7a   : > { %1668 = dma.done.wait (%p2144_p1), %s413_s9, 128  }
  0x7b   : > { %1670 = vsyncadd (%p2144_p1), %s413_s9, 4294967168  ;;  %p2145_p3 = scmp.eq.s32.totalorder %s1795_s23, 0 }
  0x7d   : > { %1672 = dma.done.wait (%p2145_p3), [#allocation6], 4096   ;;  %p2146_p4 = pmov %p2145_p3 }
  0x7e   : > { %p2147_p12 = pmov %p2145_p3 }
  0x7f   : > { %1674 = vsyncadd (%p2146_p4), [#allocation6], 4294963200 }
  0x80   : > { %1676 = dma.done.wait (%p2147_p12), [#allocation9], 4096   ;;  %p2148_p6 = pmov %p2145_p3 }
  0x81   : > { %p2149_p2 = pmov %p2145_p3 }
  0x82   : > { %1678 = vsyncadd (%p2148_p6), [#allocation9], 4294963200 }
  0x83   : > { %1680 = dma.done.wait (%p2149_p2), [#allocation12], 2048   ;;  %p2150_p7 = pmov %p2149_p2 }
  0x84   : > { %v1711_v0 = vmov 0.0   ;;  %vm1712_vm0 = vmmov 0   ;;  %v491_v1 = vld [vmem:[#allocation5 + $0x78] sm:$0xff]  ;;  %v490_v2 = vld [vmem:[#allocation5 + $0x70] sm:$0xff]  ;;  %v489_v3 = vld [vmem:[#allocation5 + $0x68] sm:$0xff]  ;;  %s1103_s21 = sshll.u32 %s1795_s23, 7 }
  0x85   : > { %1682 = vsyncadd (%p2150_p7), [#allocation12], 4294965248  ;;  %1191 = vmatprep.subr.mxu0 %v1711_v0  ;;  %1223 = vmatprep.mubr.msk.f32.mxu0 %vm1712_vm0, %v1711_v0  ;;  %v488_v4 = vld [vmem:[#allocation5 + $0x60] sm:$0xff]  ;;  %v585_v5 = vld [vmem:[#allocation7 + $0x78] sm:$0xff]  ;;  %s474_s14 = scalar_lea.vmem [#allocation13], %s1090_s7  ;;  %s959_s3 = scalar_lea.hbm %s2120_s11, %s1103_s21 }
  0x86   : > { %1226 = vmatprep.subr.mxu1 %v1711_v0  ;;  %1258 = vmatprep.mubr.msk.f32.mxu1 %vm1712_vm0, %v1711_v0  ;;  %v487_v6 = vld [vmem:[#allocation5 + $0x58] sm:$0xff]  ;;  %v584_v7 = vld [vmem:[#allocation7 + $0x70] sm:$0xff]  ;;  %v583_v8 = vld [vmem:[#allocation7 + $0x68] sm:$0xff]  ;;  %s961_s9 = sshll.u32 %s474_s14, 4  ;;  %s948_s24 = scalar_lea.sflag [#allocation4], %s1942_s5  ;;  %s962_s9 = int_to_ptr.vmem [resolvable:$true] %s961_s9 }
  0x87   : > { %1192 = vmatpush3.msra.mxu0 %v491_v1  ;;  %1227 = vmatpush3.msra.mxu1 %v585_v5  ;;  %v486_v9 = vld [vmem:[#allocation5 + $0x50] sm:$0xff]  ;;  %v582_v10 = vld [vmem:[#allocation7 + $0x60] sm:$0xff]  ;;  %v485_v11 = vld [vmem:[#allocation5 + $0x48] sm:$0xff]  ;;  %s1625_s29 = scalar_lea.vmem %s962_s9, 128  ;;  %p2151_p11 = scmp.ne.s32.totalorder %s2140_s13, 0 }
  0x88   : > { %1193 = vmatprep.subr.mxu0 %v1711_v0  ;;  %1228 = vmatprep.subr.mxu1 %v1711_v0  ;;  %v581_v12 = vld [vmem:[#allocation7 + $0x58] sm:$0xff]  ;;  %v484_v13 = vld [vmem:[#allocation5 + $0x40] sm:$0xff]  ;;  %v580_v14 = vld [vmem:[#allocation7 + $0x50] sm:$0xff]  ;;  %p1626_p8 = scmp.ne.s32.totalorder %s962_s9, %s1625_s29  ;;  %s1713_s16 = smov [#allocation13]  }
  0x89   : > { %1194 = vmatpush3.msra.mxu0 %v490_v2  ;;  %1229 = vmatpush3.msra.mxu1 %v584_v7  ;;  %v483_v15 = vld [vmem:[#allocation5 + $0x38] sm:$0xff]  ;;  %v579_v16 = vld [vmem:[#allocation7 + $0x48] sm:$0xff]  ;;  %v482_v17 = vld [vmem:[#allocation5 + $0x30] sm:$0xff]  ;;  %s1629_s23 = sshll.u32 %s1713_s16, 4  ;;  %s1630_s23 = int_to_ptr.vmem [resolvable:$false] %s1629_s23 }
  0x8a   : > { %1195 = vmatprep.subr.mxu0 %v1711_v0  ;;  %1230 = vmatprep.subr.mxu1 %v1711_v0  ;;  %v578_v18 = vld [vmem:[#allocation7 + $0x40] sm:$0xff]  ;;  %v481_v19 = vld [vmem:[#allocation5 + $0x28] sm:$0xff]  ;;  %v577_v20 = vld [vmem:[#allocation7 + $0x38] sm:$0xff]  ;;  %p1627_p0 = pnand %p1626_p8, %p2151_p11  ;;  %s1631_s7 = scalar_lea.vmem %s1630_s23, 256 }
  0x8b   : > { %1196 = vmatpush3.msra.mxu0 %v489_v3  ;;  %1231 = vmatpush3.msra.mxu1 %v583_v8  ;;  %v480_v21 = vld [vmem:[#allocation5 + $0x20] sm:$0xff]  ;;  %v576_v22 = vld [vmem:[#allocation7 + $0x30] sm:$0xff]  ;;  %v479_v23 = vld [vmem:[#allocation5 + $0x18] sm:$0xff]  ;;  %p1632_p5 = scmp.lt.s32.totalorder %s962_s9, %s1630_s23  ;;  %p1633_p9 = scmp.lt.s32.totalorder %s1631_s7, %s1625_s29 }
  0x8c   : > { %1197 = vmatprep.subr.mxu0 %v1711_v0  ;;  %1232 = vmatprep.subr.mxu1 %v1711_v0  ;;  %v575_v24 = vld [vmem:[#allocation7 + $0x28] sm:$0xff]  ;;  %v478_v25 = vld [vmem:[#allocation5 + $0x10] sm:$0xff]  ;;  %v574_v26 = vld [vmem:[#allocation7 + $0x20] sm:$0xff]  ;;  %p1628_p13 = pneg %p1627_p0 }
  0x8d   : > { %1198 = vmatpush3.msra.mxu0 %v488_v4  ;;  %1233 = vmatpush3.msra.mxu1 %v582_v10  ;;  %v477_v27 = vld [vmem:[#allocation5 + $0x8] sm:$0xff]  ;;  %v573_v28 = vld [vmem:[#allocation7 + $0x18] sm:$0xff]  ;;  %v476_v29 = vld [vmem:[#allocation5] sm:$0xff]  ;;  %p1634_p10 = por %p1633_p9, %p1632_p5 }
  0x8e   : > { %1199 = vmatprep.subr.mxu0 %v1711_v0  ;;  %1234 = vmatprep.subr.mxu1 %v1711_v0  ;;  %v475_v30 = vld [vmem:[%s1948_s28] sm:$0xff]  ;;  %v571_v32 = vld [vmem:[#allocation7 + $0x8] sm:$0xff]  ;;  %v570_v33 = vld [vmem:[#allocation7] sm:$0xff] }
  0x8f   : > { %1200 = vmatpush3.msra.mxu0 %v487_v6  ;;  %1235 = vmatpush3.msra.mxu1 %v581_v12  ;;  %v572_v31 = vld [vmem:[#allocation7 + $0x10] sm:$0xff]  ;;  %v679_v34 = vld [vmem:[#allocation8 + $0x78] sm:$0xff]  ;;  %v677_v36 = vld [vmem:[#allocation8 + $0x68] sm:$0xff]  ;;  %p1635_p1 = pnand %p1634_p10, %p1628_p13 }
  0x90   : > { %1201 = vmatprep.subr.mxu0 %v1711_v0  ;;  %1236 = vmatprep.subr.mxu1 %v1711_v0  ;;  %v678_v35 = vld [vmem:[#allocation8 + $0x70] sm:$0xff]  ;;  %v676_v37 = vld [vmem:[#allocation8 + $0x60] sm:$0xff]  ;;  %v675_v38 = vld [vmem:[#allocation8 + $0x58] sm:$0xff] }
  0x91   : > { %1202 = vmatpush3.msra.mxu0 %v486_v9  ;;  %1237 = vmatpush3.msra.mxu1 %v580_v14  ;;  %v674_v39 = vld [vmem:[#allocation8 + $0x50] sm:$0xff]  ;;  %v673_v40 = vld [vmem:[#allocation8 + $0x48] sm:$0xff]  ;;  %v672_v41 = vld [vmem:[#allocation8 + $0x40] sm:$0xff] }
  0x92   : > { %1203 = vmatprep.subr.mxu0 %v1711_v0  ;;  %1238 = vmatprep.subr.mxu1 %v1711_v0  ;;  %v671_v42 = vld [vmem:[#allocation8 + $0x38] sm:$0xff]  ;;  %v670_v43 = vld [vmem:[#allocation8 + $0x30] sm:$0xff]  ;;  %v669_v44 = vld [vmem:[#allocation8 + $0x28] sm:$0xff] }
  0x93   : > { %1204 = vmatpush3.msra.mxu0 %v485_v11  ;;  %1239 = vmatpush3.msra.mxu1 %v579_v16  ;;  %v668_v45 = vld [vmem:[#allocation8 + $0x20] sm:$0xff]  ;;  %v667_v46 = vld [vmem:[#allocation8 + $0x18] sm:$0xff]  ;;  %v1097_v47 = vld [vmem:[%s2111_s2] ss:$0 sm:$0xff] }
  0x94   : > { %1205 = vmatprep.subr.mxu0 %v1711_v0  ;;  %1240 = vmatprep.subr.mxu1 %v1711_v0  ;;  %v666_v52 = vld [vmem:[#allocation8 + $0x10] sm:$0xff]  ;;  %v665_v53 = vld [vmem:[#allocation8 + $0x8] sm:$0xff]  ;;  %v664_v54 = vld [vmem:[#allocation8] sm:$0xff] }
  0x95   : > { %1206 = vmatpush3.msra.mxu0 %v484_v13  ;;  %1241 = vmatpush3.msra.mxu1 %v578_v18  ;;  %v773_v55 = vld [vmem:[#allocation10 + $0x78] sm:$0xff]  ;;  %v772_v56 = vld [vmem:[#allocation10 + $0x70] sm:$0xff]  ;;  %v771_v57 = vld [vmem:[#allocation10 + $0x68] sm:$0xff] }
  0x96   : > { %1207 = vmatprep.subr.mxu0 %v1711_v0  ;;  %1242 = vmatprep.subr.mxu1 %v1711_v0  ;;  %v770_v58 = vld [vmem:[#allocation10 + $0x60] sm:$0xff]  ;;  %v769_v59 = vld [vmem:[#allocation10 + $0x58] sm:$0xff]  ;;  %v768_v60 = vld [vmem:[#allocation10 + $0x50] sm:$0xff] }
  0x97   : > { %1208 = vmatpush3.msra.mxu0 %v483_v15  ;;  %1243 = vmatpush3.msra.mxu1 %v577_v20  ;;  %v767_v61 = vld [vmem:[#allocation10 + $0x48] sm:$0xff]  ;;  %v766_v62 = vld [vmem:[#allocation10 + $0x40] sm:$0xff]  ;;  %v765_v63 = vld [vmem:[#allocation10 + $0x38] sm:$0xff] }
  0x98   : > { %1209 = vmatprep.subr.mxu0 %v1711_v0  ;;  %1244 = vmatprep.subr.mxu1 %v1711_v0  ;;  %v764_v1 = vld [vmem:[#allocation10 + $0x30] sm:$0xff]  ;;  %v763_v2 = vld [vmem:[#allocation10 + $0x28] sm:$0xff]  ;;  %v762_v3 = vld [vmem:[#allocation10 + $0x20] sm:$0xff] }
  0x99   : > { %1210 = vmatpush3.msra.mxu0 %v482_v17  ;;  %1245 = vmatpush3.msra.mxu1 %v576_v22  ;;  %v761_v4 = vld [vmem:[#allocation10 + $0x18] sm:$0xff]  ;;  %v1098_v5 = vld [vmem:[%s2113_s4] ss:$0 sm:$0xff]  ;;  %v759_v11 = vld [vmem:[#allocation10 + $0x8] sm:$0xff] }
  0x9a   : > { %1211 = vmatprep.subr.mxu0 %v1711_v0  ;;  %1246 = vmatprep.subr.mxu1 %v1711_v0  ;;  %v760_v10 = vld [vmem:[#allocation10 + $0x10] sm:$0xff]  ;;  %v758_v12 = vld [vmem:[#allocation10] sm:$0xff]  ;;  %v867_v13 = vld [vmem:[#allocation11 + $0x78] sm:$0xff] }
  0x9b   : > { %1212 = vmatpush3.msra.mxu0 %v481_v19  ;;  %1247 = vmatpush3.msra.mxu1 %v575_v24  ;;  %v866_v14 = vld [vmem:[#allocation11 + $0x70] sm:$0xff]  ;;  %v865_v15 = vld [vmem:[#allocation11 + $0x68] sm:$0xff]  ;;  %v864_v16 = vld [vmem:[#allocation11 + $0x60] sm:$0xff] }
  0x9c   : > { %1213 = vmatprep.subr.mxu0 %v1711_v0  ;;  %1248 = vmatprep.subr.mxu1 %v1711_v0  ;;  %v863_v17 = vld [vmem:[#allocation11 + $0x58] sm:$0xff]  ;;  %v862_v18 = vld [vmem:[#allocation11 + $0x50] sm:$0xff]  ;;  %v861_v19 = vld [vmem:[#allocation11 + $0x48] sm:$0xff] }
  0x9d   : > { %1214 = vmatpush3.msra.mxu0 %v480_v21  ;;  %1249 = vmatpush3.msra.mxu1 %v574_v26  ;;  %v860_v20 = vld [vmem:[#allocation11 + $0x40] sm:$0xff]  ;;  %v859_v21 = vld [vmem:[#allocation11 + $0x38] sm:$0xff]  ;;  %v858_v22 = vld [vmem:[#allocation11 + $0x30] sm:$0xff] }
  0x9e   : > { %1215 = vmatprep.subr.mxu0 %v1711_v0  ;;  %1250 = vmatprep.subr.mxu1 %v1711_v0  ;;  %v856_v24 = vld [vmem:[#allocation11 + $0x20] sm:$0xff]  ;;  %v1099_v26 = vld [vmem:[%s2115_s6] ss:$0 sm:$0xff] }
  0x9f   : > { %1216 = vmatpush3.msra.mxu0 %v479_v23  ;;  %1251 = vmatpush3.msra.mxu1 %v573_v28  ;;  %v857_v23 = vld [vmem:[#allocation11 + $0x28] sm:$0xff] }
  0xa0   : > { %1217 = vmatprep.subr.mxu0 %v1711_v0  ;;  %1252 = vmatprep.subr.mxu1 %v1711_v0 }
  0xa1   : > { %1218 = vmatpush3.msra.mxu0 %v478_v25  ;;  %1253 = vmatpush3.msra.mxu1 %v572_v31  ;;  %v855_v25 = vld [vmem:[#allocation11 + $0x18] sm:$0xff]  ;;  %v854_v31 = vld [vmem:[#allocation11 + $0x10] sm:$0xff] }
  0xa2   : > { %1219 = vmatprep.subr.mxu0 %v1711_v0  ;;  %1254 = vmatprep.subr.mxu1 %v1711_v0 }
  0xa3   : > { %1220 = vmatpush3.msra.mxu0 %v477_v27  ;;  %1255 = vmatpush3.msra.mxu1 %v571_v32  ;;  %v853_v32 = vld [vmem:[#allocation11 + $0x8] sm:$0xff] }
  0xa4   : > { %1221 = vmatprep.subr.mxu0 %v1711_v0  ;;  %1256 = vmatprep.subr.mxu1 %v1711_v0 }
  0xa5   : > { %1222 = vmatpush3.msra.mxu0 %v476_v29  ;;  %1257 = vmatpush3.msra.mxu1 %v570_v33  ;;  %v852_v33 = vld [vmem:[#allocation11] sm:$0xff] }
  0xa6   : > { %1224 = vmatmul.mubr.f32.vlgmr.msra.gmra.mxu0 %v475_v30  ;;  %1261 = vmatprep.subr.mxu0 %v1711_v0 }
  0xa7   : > { %1293 = vmatprep.mubr.msk.f32.mxu0 %vm1712_vm0, %v1711_v0  ;;  %1296 = vmatprep.subr.mxu1 %v1711_v0 }
  0xa8   : > { %1262 = vmatpush3.msra.mxu0 %v679_v34  ;;  %v1100_v34 = vld [vmem:[%s2117_s8] ss:$0 sm:$0xff] }
  0xa9   : > { %1263 = vmatprep.subr.mxu0 %v1711_v0 }
  0xaa   : > { %1264 = vmatpush3.msra.mxu0 %v678_v35 }
  0xab   : > { %1265 = vmatprep.subr.mxu0 %v1711_v0 }
  0xac   : > { %1266 = vmatpush3.msra.mxu0 %v677_v36 }
  0xad   : > { %1267 = vmatprep.subr.mxu0 %v1711_v0 }
  0xae   : > { %1268 = vmatpush3.msra.mxu0 %v676_v37 }
  0xaf   : > { %1269 = vmatprep.subr.mxu0 %v1711_v0 }
  0xb0   : > { %1270 = vmatpush3.msra.mxu0 %v675_v38 }
  0xb1   : > { %1271 = vmatprep.subr.mxu0 %v1711_v0 }
  0xb2   : > { %1272 = vmatpush3.msra.mxu0 %v674_v39  ;;  %v1101_v39 = vld [vmem:[%s2119_s10] ss:$0 sm:$0xff] }
  0xb3   : > { %1273 = vmatprep.subr.mxu0 %v1711_v0 }
  0xb4   : > { %1274 = vmatpush3.msra.mxu0 %v673_v40 }
  0xb5   : > { %1275 = vmatprep.subr.mxu0 %v1711_v0 }
  0xb6   : > { %1276 = vmatpush3.msra.mxu0 %v672_v41 }
  0xb7   : > { %1277 = vmatprep.subr.mxu0 %v1711_v0 }
  0xb8   : > { %1278 = vmatpush3.msra.mxu0 %v671_v42 }
  0xb9   : > { %1279 = vmatprep.subr.mxu0 %v1711_v0 }
  0xba   : > { %1280 = vmatpush3.msra.mxu0 %v670_v43 }
  0xbb   : > { %1281 = vmatprep.subr.mxu0 %v1711_v0 }
  0xbc   : > { %1282 = vmatpush3.msra.mxu0 %v669_v44 }
  0xbd   : > { %1283 = vmatprep.subr.mxu0 %v1711_v0 }
  0xbe   : > { %1284 = vmatpush3.msra.mxu0 %v668_v45 }
  0xbf   : > { %1285 = vmatprep.subr.mxu0 %v1711_v0 }
  0xc0   : > { %1286 = vmatpush3.msra.mxu0 %v667_v46 }
  0xc1   : > { %1287 = vmatprep.subr.mxu0 %v1711_v0 }
  0xc2   : > { %1288 = vmatpush3.msra.mxu0 %v666_v52 }
  0xc3   : > { %1289 = vmatprep.subr.mxu0 %v1711_v0 }
  0xc4   : > { %1290 = vmatpush3.msra.mxu0 %v665_v53 }
  0xc5   : > { %1291 = vmatprep.subr.mxu0 %v1711_v0 }
  0xc6   : > { %1292 = vmatpush3.msra.mxu0 %v664_v54 }
  0xc7   : > { %1331 = vmatprep.subr.mxu0 %v1711_v0 }
 0x166   : > { %v565_v48 = vpop.f32.mrf.mxu0 }
 0x167   : > { %v566_v49 = vadd.f32 %v1097_v47, %v565_v48 }
 0x168   : > { %v1225_v50 = vpop.f32.mrf.mxu0 }
 0x169   : > { %v569_v51 = vmax.f32 %v566_v49, 0.0 }
 0x16b   : > { %1259 = vmatmul.mubr.f32.vlgmr.msra.gmra.mxu1 %v569_v51 }
 0x16c   : > { %1328 = vmatprep.mubr.msk.f32.mxu1 %vm1712_vm0, %v1711_v0  ;;  %1297 = vmatpush3.msra.mxu1 %v773_v55 }
 0x16d   : > { %1298 = vmatprep.subr.mxu1 %v1711_v0 }
 0x16e   : > { %1299 = vmatpush3.msra.mxu1 %v772_v56 }
 0x16f   : > { %1300 = vmatprep.subr.mxu1 %v1711_v0 }
 0x170   : > { %1301 = vmatpush3.msra.mxu1 %v771_v57 }
 0x171   : > { %1302 = vmatprep.subr.mxu1 %v1711_v0 }
 0x172   : > { %1303 = vmatpush3.msra.mxu1 %v770_v58 }
 0x173   : > { %1304 = vmatprep.subr.mxu1 %v1711_v0 }
 0x174   : > { %1305 = vmatpush3.msra.mxu1 %v769_v59 }
 0x175   : > { %1306 = vmatprep.subr.mxu1 %v1711_v0 }
 0x176   : > { %1307 = vmatpush3.msra.mxu1 %v768_v60 }
 0x177   : > { %1308 = vmatprep.subr.mxu1 %v1711_v0 }
 0x178   : > { %1309 = vmatpush3.msra.mxu1 %v767_v61 }
 0x179   : > { %1310 = vmatprep.subr.mxu1 %v1711_v0 }
 0x17a   : > { %1311 = vmatpush3.msra.mxu1 %v766_v62 }
 0x17b   : > { %1312 = vmatprep.subr.mxu1 %v1711_v0 }
 0x17c   : > { %1313 = vmatpush3.msra.mxu1 %v765_v63 }
 0x17d   : > { %1314 = vmatprep.subr.mxu1 %v1711_v0 }
 0x17e   : > { %1315 = vmatpush3.msra.mxu1 %v764_v1 }
 0x17f   : > { %1316 = vmatprep.subr.mxu1 %v1711_v0 }
 0x180   : > { %1317 = vmatpush3.msra.mxu1 %v763_v2 }
 0x181   : > { %1318 = vmatprep.subr.mxu1 %v1711_v0 }
 0x182   : > { %1319 = vmatpush3.msra.mxu1 %v762_v3 }
 0x183   : > { %1320 = vmatprep.subr.mxu1 %v1711_v0 }
 0x184   : > { %1321 = vmatpush3.msra.mxu1 %v761_v4 }
 0x185   : > { %1322 = vmatprep.subr.mxu1 %v1711_v0 }
 0x186   : > { %1323 = vmatpush3.msra.mxu1 %v760_v10 }
 0x187   : > { %1324 = vmatprep.subr.mxu1 %v1711_v0 }
 0x188   : > { %1325 = vmatpush3.msra.mxu1 %v759_v11 }
 0x189   : > { %1326 = vmatprep.subr.mxu1 %v1711_v0 }
 0x18a   : > { %1327 = vmatpush3.msra.mxu1 %v758_v12 }
 0x22b   : > { %v659_v6 = vpop.f32.mrf.mxu1 }
 0x22c   : > { %v660_v7 = vadd.f32 %v1098_v5, %v659_v6 }
 0x22d   : > { %v1260_v8 = vpop.f32.mrf.mxu1 }
 0x22e   : > { %v663_v9 = vmax.f32 %v660_v7, 0.0 }
 0x230   : > { %1294 = vmatmul.mubr.f32.vlgmr.msra.gmra.mxu0 %v663_v9 }
 0x231   : > { %1363 = vmatprep.mubr.msk.f32.mxu0 %vm1712_vm0, %v1711_v0  ;;  %1332 = vmatpush3.msra.mxu0 %v867_v13 }
 0x232   : > { %1333 = vmatprep.subr.mxu0 %v1711_v0 }
 0x233   : > { %1334 = vmatpush3.msra.mxu0 %v866_v14 }
 0x234   : > { %1335 = vmatprep.subr.mxu0 %v1711_v0 }
 0x235   : > { %1336 = vmatpush3.msra.mxu0 %v865_v15 }
 0x236   : > { %1337 = vmatprep.subr.mxu0 %v1711_v0 }
 0x237   : > { %1338 = vmatpush3.msra.mxu0 %v864_v16 }
 0x238   : > { %1339 = vmatprep.subr.mxu0 %v1711_v0 }
 0x239   : > { %1340 = vmatpush3.msra.mxu0 %v863_v17 }
 0x23a   : > { %1341 = vmatprep.subr.mxu0 %v1711_v0 }
 0x23b   : > { %1342 = vmatpush3.msra.mxu0 %v862_v18 }
 0x23c   : > { %1343 = vmatprep.subr.mxu0 %v1711_v0 }
 0x23d   : > { %1344 = vmatpush3.msra.mxu0 %v861_v19 }
 0x23e   : > { %1345 = vmatprep.subr.mxu0 %v1711_v0 }
 0x23f   : > { %1346 = vmatpush3.msra.mxu0 %v860_v20 }
 0x240   : > { %1347 = vmatprep.subr.mxu0 %v1711_v0 }
 0x241   : > { %1348 = vmatpush3.msra.mxu0 %v859_v21 }
 0x242   : > { %1349 = vmatprep.subr.mxu0 %v1711_v0 }
 0x243   : > { %1350 = vmatpush3.msra.mxu0 %v858_v22 }
 0x244   : > { %1351 = vmatprep.subr.mxu0 %v1711_v0 }
 0x245   : > { %1352 = vmatpush3.msra.mxu0 %v857_v23 }
 0x246   : > { %1353 = vmatprep.subr.mxu0 %v1711_v0 }
 0x247   : > { %1354 = vmatpush3.msra.mxu0 %v856_v24 }
 0x248   : > { %1355 = vmatprep.subr.mxu0 %v1711_v0 }
 0x249   : > { %1356 = vmatpush3.msra.mxu0 %v855_v25 }
 0x24a   : > { %1357 = vmatprep.subr.mxu0 %v1711_v0 }
 0x24b   : > { %1358 = vmatpush3.msra.mxu0 %v854_v31 }
 0x24c   : > { %1359 = vmatprep.subr.mxu0 %v1711_v0 }
 0x24d   : > { %1360 = vmatpush3.msra.mxu0 %v853_v32 }
 0x24e   : > { %1361 = vmatprep.subr.mxu0 %v1711_v0 }
 0x24f   : > { %1362 = vmatpush3.msra.mxu0 %v852_v33 }
 0x2f0   : > { %v753_v27 = vpop.f32.mrf.mxu0 }
 0x2f1   : > { %v754_v28 = vadd.f32 %v1099_v26, %v753_v27 }
 0x2f2   : > { %v1295_v29 = vpop.f32.mrf.mxu0 }
 0x2f3   : > { %v757_v30 = vmax.f32 %v754_v28, 0.0 }
 0x2f5   : > { %1329 = vmatmul.mubr.f32.vlgmr.msra.gmra.mxu1 %v757_v30 }
 0x3b5   : > { %v847_v35 = vpop.f32.mrf.mxu1 }
 0x3b6   : > { %v848_v36 = vadd.f32 %v1100_v34, %v847_v35 }
 0x3b7   : > { %v1330_v37 = vpop.f32.mrf.mxu1 }
 0x3b8   : > { %v851_v38 = vmax.f32 %v848_v36, 0.0 }
 0x3ba   : > { %1364 = vmatmul.mubr.f32.vlgmr.msra.gmra.mxu0 %v851_v38 }
 0x47a   : > { %v941_v40 = vpop.f32.mrf.mxu0 }
 0x47b   : > { %v942_v0 = vadd.f32 %v1101_v39, %v941_v40 }
 0x47c   : > { %v1365_v41 = vpop.f32.mrf.mxu0 }
 0x47d   : > { %v945_v42 = vmax.f32 %v942_v0, 0.0 }
 0x47f   : > { %946 = vst [vmem:[%s474_s14] sm:$0xff] %v945_v42 }
 0x480   : > { %1638 = shalt.err (!%p1635_p1)
}
 0x481   : > { %s1639_s27 = scalar_lea.hbm %s959_s3, 128  ;;  %s1643_s15 = scalar_lea.hbm %s2120_s11, 256 }
 0x482   : > { %p1640_p3 = scmp.ne.s32.totalorder %s959_s3, %s1639_s27  ;;  %p1644_p6 = scmp.lt.s32.totalorder %s959_s3, %s2120_s11 }
 0x483   : > { %p1645_p2 = scmp.lt.s32.totalorder %s1643_s15, %s1639_s27 }
 0x484   : > { %p1641_p4 = pnand %p1640_p3, %p2151_p11 }
 0x485   : > { %p1646_p7 = por %p1645_p2, %p1644_p6 }
 0x486   : > { %p1642_p12 = pneg %p1641_p4 }
 0x488   : > { %p1647_p8 = pnand %p1646_p7, %p1642_p12 }
 0x48a   : > { %1650 = shalt.err (!%p1647_p8)
}
 0x48b   : > { %1388 = dma.vmem_to_hbm [thread:$0]  (%p2151_p11), %s962_s9, 128, %s959_s3, %s948_s24  }
 0x48c PF: > { %s973_s21 = sand.u32 1, %s1689_s17   ;;  %p2152_p0 = scmp.ne.s32.totalorder %s2141_s25, 0 }
 0x48d   : > { %p2153_p13 = scmp.ge.s32.totalorder %s1701_s20, 2  ;;  %s974_s14 = scalar_lea.sflag [#allocation4], %s973_s21 }
 0x48f   : > { %p1411_p5 = pnand %p2153_p13, %p2152_p0 }
 0x491   : > { %p1412_p9 = pneg %p1411_p5 }
 0x493   : > { %1684 = dma.done.wait (%p1412_p9), %s974_s14, 128  }
 0x494   : > { %1686 = vsyncadd (%p1412_p9), %s974_s14, 4294967168  ;;  %s2154_s28 = sld [smem:[#allocation19_spill]]  ;;  %p27_p10 = scmp.ge.s32.totalorder %s1885_s30, 4  }
 0x495   : > { %s2155_s17 = smov %s1693_s18  ;;  %s2156_s18 = smov %s1697_s19 }
 0x496   : > { %s2158_s20 = smov %s1885_s30  ;;  %29 = sbr.rel (!%p27_p10) target bundleno = 14 (0xe), region = 129 }
 0x49a   : > { %s2157_s19 = smov %s2154_s28 }
 0x49b   :  { %979 = vsyncpa [#allocation3], 1 }
 0x49c   :  { %981 = vsyncpa [#allocation3 + $0x1], 1 }
 0x49d   :  { %982 = vsyncpa [#allocation6], 1 }
 0x49e   :  { %983 = vsyncpa [#allocation9], 1 }
 0x49f   :  { %984 = vsyncpa [#allocation12], 1 }
 0x4a0   :  { %985 = vsyncpa [#allocation4], 1 }
 0x4a1   :  { %987 = vsyncpa [#allocation4 + $0x1], 1 }

</bundles_post_ra>
